<compile_context>
chip_gen: v7x
topology: tpu7x:2x2x1
jax: 0.10.0
libtpu: 0.0.40
codegen_flags: <defaults>
</compile_context>

<pallas_src>
import functools

import jax
import jax.numpy as jnp
from jax.experimental import pallas as pl
from jax.experimental.pallas import tpu as pltpu


def _highway_kernel(x_ref, w_ref, b_ref, o_ref, *, e_word):
    # x_ref: (tm, E), w_ref: (E, 2E) = [W_proj | W_gate], b_ref: (1, 2E) f32,
    # o_ref: (tm, E)
    x = x_ref[...]

    # Single fused GEMM on the MXU, f32 accumulation. Operands stay in their
    # native dtype (bf16 inputs hit the bf16 MXU path directly).
    y = jnp.dot(x, w_ref[...], preferred_element_type=jnp.float32) + b_ref[...]

    proj = jnp.maximum(y[:, :e_word], 0.0)        # ReLU  (VPU)
    gate = jax.nn.sigmoid(y[:, e_word:])          # sigmoid (EUP)

    x_f32 = x.astype(jnp.float32)
    out = x_f32 + gate * (proj - x_f32)           # highway combine (3 VPU ops)
    o_ref[...] = out.astype(o_ref.dtype)


@functools.partial(jax.jit, static_argnames=("tm",))
def highway_forward(x_conv, w_proj, b_proj, w_gate, b_gate, *, tm=None):
    """x_conv: (s_len, b, e_word) -> (s_len, b, e_word). Dropout is identity."""
    s_len, b, e_word = x_conv.shape
    n_rows = s_len * b
    x2d = x_conv.reshape(n_rows, e_word)

    # Fuse the two Linear layers: one (E, 2E) weight / (1, 2E) bias. Fills the
    # 256-wide MXU on v6e/v7x and pushes x through the MXU once instead of twice.
    w_fused = jnp.concatenate(
        [w_proj.astype(x2d.dtype), w_gate.astype(x2d.dtype)], axis=1)
    b_fused = jnp.concatenate([b_proj, b_gate]).astype(jnp.float32)
    b_fused = b_fused.reshape(1, 2 * e_word)

    # Large row tiles: whole N when small, else 512-row tiles (multiple of 8,
    # keeps >=2 parallel grid steps on large N so both v7x TCs get work).
    if tm is None:
        tm = n_rows if n_rows <= 512 else 512

    grid = (pl.cdiv(n_rows, tm),)

    itemsize_x = jnp.dtype(x2d.dtype).itemsize
    itemsize_w = jnp.dtype(w_fused.dtype).itemsize
    cost = pl.CostEstimate(
        flops=4 * n_rows * e_word * e_word,          # (N,E)@(E,2E)
        transcendentals=n_rows * e_word,             # sigmoid
        bytes_accessed=(2 * n_rows * e_word * itemsize_x            # x + out
                        + 2 * e_word * e_word * itemsize_w          # fused W
                        + 2 * e_word * 4))                          # fused b

    out2d = pl.pallas_call(
        functools.partial(_highway_kernel, e_word=e_word),
        out_shape=jax.ShapeDtypeStruct((n_rows, e_word), x_conv.dtype),
        grid_spec=pltpu.PrefetchScalarGridSpec(
            num_scalar_prefetch=0,
            grid=grid,
            in_specs=[
                pl.BlockSpec((tm, e_word), lambda i: (i, 0)),           # x rows
                pl.BlockSpec((e_word, 2 * e_word), lambda i: (0, 0)),   # W fused
                pl.BlockSpec((1, 2 * e_word), lambda i: (0, 0)),        # b fused
            ],
            out_specs=pl.BlockSpec((tm, e_word), lambda i: (i, 0)),
        ),
        compiler_params=pltpu.CompilerParams(
            dimension_semantics=("parallel",)),
        cost_estimate=cost,
    )(x2d, w_fused, b_fused)

    return out2d.reshape(s_len, b, e_word)


def _reference(x_conv, w_proj, b_proj, w_gate, b_gate):
    proj = jax.nn.relu(jnp.einsum("sbe,ef->sbf", x_conv, w_proj) + b_proj)
    gate = jax.nn.sigmoid(jnp.einsum("sbe,ef->sbf", x_conv, w_gate) + b_gate)
    return gate * proj + (1.0 - gate) * x_conv


if __name__ == "__main__":
    # Small shapes consistent with the module: s_len=8, b=2, e_word=128.
    s_len, batch, e_word = 8, 2, 128
    dropout = 0.3  # unused at inference (identity)

    key = jax.random.PRNGKey(0)
    kx, kwp, kbp, kwg, kbg = jax.random.split(key, 5)

    x_conv = jax.random.normal(kx, (s_len, batch, e_word), dtype=jnp.float32)
    # Deterministic parameter init (Linear(e_word, e_word) x2), stored as W.T
    scale = 1.0 / jnp.sqrt(e_word)
    w_proj = jax.random.uniform(kwp, (e_word, e_word), jnp.float32, -scale, scale)
    b_proj = jax.random.uniform(kbp, (e_word,), jnp.float32, -scale, scale)
    w_gate = jax.random.uniform(kwg, (e_word, e_word), jnp.float32, -scale, scale)
    b_gate = jax.random.uniform(kbg, (e_word,), jnp.float32, -scale, scale)

    out = highway_forward(x_conv, w_proj, b_proj, w_gate, b_gate)
    out = jax.block_until_ready(out)

    ref = _reference(x_conv, w_proj, b_proj, w_gate, b_gate)
    assert out.shape == (s_len, batch, e_word)
    assert jnp.allclose(out, ref, atol=1e-5, rtol=1e-5), "mismatch vs reference"

    print("KERNEL_OK")
</pallas_src>

<mosaic_0001>
module attributes {stable_mosaic.version = 11 : i64} {
  func.func @_highway_kernel(%arg0: i32, %arg1: memref<16x128xf32, #tpu.memory_space<vmem>>, %arg2: memref<128x256xf32, #tpu.memory_space<vmem>>, %arg3: memref<1x256xf32, #tpu.memory_space<vmem>>, %arg4: memref<16x128xf32, #tpu.memory_space<vmem>>) attributes {dimension_semantics = [#tpu.dimension_semantics<parallel>], iteration_bounds = array<i64: 1>, scalar_prefetch = 0 : i64, scratch_operands = 0 : i64, tpu.core_type = #tpu.core_type<tc>, window_params = [{transform_indices = @transform_0, window_bounds = array<i64: 16, 128>}, {pipeline_mode = #tpu.pipeline_mode<synchronous>, transform_indices = @transform_1, window_bounds = array<i64: 128, 256>}, {pipeline_mode = #tpu.pipeline_mode<synchronous>, transform_indices = @transform_2, window_bounds = array<i64: 1, 256>}, {transform_indices = @transform_3, window_bounds = array<i64: 16, 128>}]} {
    %c0 = arith.constant 0 : index
    %c0_0 = arith.constant 0 : index
    %0 = vector.load %arg1[%c0, %c0_0] : memref<16x128xf32, #tpu.memory_space<vmem>>, vector<16x128xf32>
    %c0_1 = arith.constant 0 : index
    %c0_2 = arith.constant 0 : index
    %1 = vector.load %arg2[%c0_1, %c0_2] : memref<128x256xf32, #tpu.memory_space<vmem>>, vector<128x256xf32>
    %cst = arith.constant dense<0.000000e+00> : vector<16x256xf32>
    %2 = tpu.matmul %0, %1, %cst {dimension_numbers = #tpu.dot_dimension_numbers<[1], [0], [0], [1], [0, 0, 1, 1], [], []>} : vector<16x128xf32>, vector<128x256xf32>, vector<16x256xf32> -> vector<16x256xf32>
    %c0_3 = arith.constant 0 : index
    %c0_4 = arith.constant 0 : index
    %3 = vector.load %arg3[%c0_3, %c0_4] : memref<1x256xf32, #tpu.memory_space<vmem>>, vector<1x256xf32>
    %4 = vector.broadcast %3 : vector<1x256xf32> to vector<16x256xf32>
    %5 = arith.addf %2, %4 : vector<16x256xf32>
    %6 = vector.extract_strided_slice %5 {offsets = [0, 0], sizes = [16, 128], strides = [1, 1]} : vector<16x256xf32> to vector<16x128xf32>
    %cst_5 = arith.constant 0.000000e+00 : f32
    %7 = vector.broadcast %cst_5 : f32 to vector<16x128xf32>
    %8 = arith.maximumf %6, %7 : vector<16x128xf32>
    %9 = vector.extract_strided_slice %5 {offsets = [0, 128], sizes = [16, 128], strides = [1, 1]} : vector<16x256xf32> to vector<16x128xf32>
    %10 = arith.negf %9 : vector<16x128xf32>
    %11 = math.exp %10 : vector<16x128xf32>
    %cst_6 = arith.constant 1.000000e+00 : f32
    %12 = vector.broadcast %cst_6 : f32 to vector<16x128xf32>
    %13 = arith.addf %12, %11 : vector<16x128xf32>
    %14 = arith.divf %12, %13 : vector<16x128xf32>
    %15 = arith.subf %8, %0 : vector<16x128xf32>
    %16 = arith.mulf %14, %15 : vector<16x128xf32>
    %17 = arith.addf %0, %16 : vector<16x128xf32>
    %c0_7 = arith.constant 0 : index
    %c0_8 = arith.constant 0 : index
    %18 = vector.load %arg4[%c0_7, %c0_8] : memref<16x128xf32, #tpu.memory_space<vmem>>, vector<16x128xf32>
    tpu.vector_store %arg4[%c0_7, %c0_8], %17 {strides = array<i32>} : memref<16x128xf32, #tpu.memory_space<vmem>>, vector<16x128xf32>,
    return
  }
  func.func @transform_0(%arg0: i32) -> (i32, i32) {
    %c0_i32 = arith.constant 0 : i32
    %c0_i32_0 = arith.constant 0 : i32
    return %arg0, %c0_i32 : i32, i32
  }
  func.func @transform_1(%arg0: i32) -> (i32, i32) {
    %c0_i32 = arith.constant 0 : i32
    %c0_i32_0 = arith.constant 0 : i32
    %c0_i32_1 = arith.constant 0 : i32
    return %c0_i32, %c0_i32_0 : i32, i32
  }
  func.func @transform_2(%arg0: i32) -> (i32, i32) {
    %c0_i32 = arith.constant 0 : i32
    %c0_i32_0 = arith.constant 0 : i32
    %c0_i32_1 = arith.constant 0 : i32
    return %c0_i32, %c0_i32_0 : i32, i32
  }
  func.func @transform_3(%arg0: i32) -> (i32, i32) {
    %c0_i32 = arith.constant 0 : i32
    %c0_i32_0 = arith.constant 0 : i32
    return %arg0, %c0_i32 : i32, i32
  }
}

</mosaic_0001>

<bundles_post_ra>
// kernel: highway_forward.1
= control target key start
LH: loop header
LB: loop body
LE: loop exit
PB: predicated region body
PF: predicated region fallthrough
CT: control target
= control target key end

     0   :  { %v262_v7 = vmov 0.0   ;;  %s403_s0 = inlined_call_operand.vmem [shape: f32[16,128], index: 0, kind: input, shape index: {}]   ;;  %s404_s1 = inlined_call_operand.vmem [shape: f32[128,256], index: 1, kind: input, shape index: {}]   ;;  %s405_s2 = inlined_call_operand.vmem [shape: f32[1,256], index: 2, kind: input, shape index: {}]   ;;  %s406_s3 = inlined_call_operand.hbm [shape: f32[16,128], index: 3, kind: output, shape index: {}]  }
   0x1   :  { %v18_v0 = vld [vmem:[%s404_s1 + $0x8] sm:$0xff]  ;;  %v20_v1 = vld [vmem:[%s404_s1 + $0x18] sm:$0xff]  ;;  %v17_v2 = vld [vmem:[%s404_s1] sm:$0xff]  ;;  %125 = vmatprep.mubr.f32.mxu0 %v262_v7  ;;  %131 = vmatprep.mubr.f32.mxu1 %v262_v7 }
   0x2   :  { %v178_v3 = vpack.c.bf16 %v20_v1, %v18_v0  ;;  %v19_v4 = vld [vmem:[%s404_s1 + $0x10] sm:$0xff]  ;;  %v22_v5 = vld [vmem:[%s404_s1 + $0x28] sm:$0xff]  ;;  %v24_v6 = vld [vmem:[%s404_s1 + $0x38] sm:$0xff] }
   0x3   :  { %v180_v8 = vpack.c.bf16 %v19_v4, %v17_v2  ;;  %v182_v9 = vpack.c.bf16 %v24_v6, %v22_v5  ;;  %v21_v10 = vld [vmem:[%s404_s1 + $0x20] sm:$0xff]  ;;  %v23_v11 = vld [vmem:[%s404_s1 + $0x30] sm:$0xff]  ;;  %v26_v12 = vld [vmem:[%s404_s1 + $0x48] sm:$0xff] }
   0x4   :  { %179 = vmatprep.subr.bf16.mxu0 %v178_v3  ;;  %210 = vmatprep.subr.bf16.mxu1 %v178_v3  ;;  %v28_v13 = vld [vmem:[%s404_s1 + $0x58] sm:$0xff]  ;;  %v184_v14 = vpack.c.bf16 %v23_v11, %v21_v10  ;;  %v25_v16 = vld [vmem:[%s404_s1 + $0x40] sm:$0xff]  ;;  %v27_v17 = vld [vmem:[%s404_s1 + $0x50] sm:$0xff] }
   0x5   :  { %181 = vmatpush1.bf16.msra.mxu0 %v180_v8  ;;  %218 = vmatpush1.bf16.msra.mxu1 %v180_v8  ;;  %v186_v15 = vpack.c.bf16 %v28_v13, %v26_v12  ;;  %v30_v18 = vld [vmem:[%s404_s1 + $0x68] sm:$0xff]  ;;  %v32_v19 = vld [vmem:[%s404_s1 + $0x78] sm:$0xff]  ;;  %v188_v20 = vpack.c.bf16 %v27_v17, %v25_v16  ;;  %v29_v22 = vld [vmem:[%s404_s1 + $0x60] sm:$0xff] }
   0x6   :  { %183 = vmatprep.subr.bf16.mxu0 %v182_v9  ;;  %211 = vmatprep.subr.bf16.mxu1 %v182_v9  ;;  %v190_v21 = vpack.c.bf16 %v32_v19, %v30_v18  ;;  %v31_v23 = vld [vmem:[%s404_s1 + $0x70] sm:$0xff]  ;;  %v34_v24 = vld [vmem:[%s404_s1 + $0x88] sm:$0xff]  ;;  %v36_v25 = vld [vmem:[%s404_s1 + $0x98] sm:$0xff] }
   0x9   :  { %185 = vmatpush1.bf16.msra.mxu0 %v184_v14  ;;  %219 = vmatpush1.bf16.msra.mxu1 %v184_v14 }
   0xa   :  { %187 = vmatprep.subr.bf16.mxu0 %v186_v15  ;;  %212 = vmatprep.subr.bf16.mxu1 %v186_v15 }
   0xb   :  { %8 = vsyncpa [#allocation3], 0  ;;  %v192_v26 = vpack.c.bf16 %v31_v23, %v29_v22  ;;  %v194_v27 = vpack.c.bf16 %v36_v25, %v34_v24  ;;  %v33_v28 = vld [vmem:[%s404_s1 + $0x80] sm:$0xff]  ;;  %v35_v29 = vld [vmem:[%s404_s1 + $0x90] sm:$0xff]  ;;  %v51_v51 = vlaneseq }
   0xc   :  { %v38_v30 = vld [vmem:[%s404_s1 + $0xa8] sm:$0xff]  ;;  %v40_v31 = vld [vmem:[%s404_s1 + $0xb8] sm:$0xff]  ;;  %v196_v32 = vpack.c.bf16 %v35_v29, %v33_v28  ;;  %v37_v34 = vld [vmem:[%s404_s1 + $0xa0] sm:$0xff] }
   0xd   :  { %189 = vmatpush1.bf16.msra.mxu0 %v188_v20  ;;  %220 = vmatpush1.bf16.msra.mxu1 %v188_v20  ;;  %v198_v33 = vpack.c.bf16 %v40_v31, %v38_v30  ;;  %v39_v35 = vld [vmem:[%s404_s1 + $0xb0] sm:$0xff]  ;;  %v42_v36 = vld [vmem:[%s404_s1 + $0xc8] sm:$0xff]  ;;  %v44_v37 = vld [vmem:[%s404_s1 + $0xd8] sm:$0xff]  ;;  %v52_v52 = vshrl.u32 %v51_v51, 7 }
   0xe   :  { %191 = vmatprep.subr.bf16.mxu0 %v190_v21  ;;  %213 = vmatprep.subr.bf16.mxu1 %v190_v21  ;;  %v200_v38 = vpack.c.bf16 %v39_v35, %v37_v34  ;;  %v202_v39 = vpack.c.bf16 %v44_v37, %v42_v36  ;;  %v41_v40 = vld [vmem:[%s404_s1 + $0xc0] sm:$0xff]  ;;  %v43_v41 = vld [vmem:[%s404_s1 + $0xd0] sm:$0xff]  ;;  %v46_v42 = vld [vmem:[%s404_s1 + $0xe8] sm:$0xff] }
   0xf   :  { %v48_v43 = vld [vmem:[%s404_s1 + $0xf8] sm:$0xff]  ;;  %v204_v44 = vpack.c.bf16 %v43_v41, %v41_v40  ;;  %v45_v46 = vld [vmem:[%s404_s1 + $0xe0] sm:$0xff]  ;;  %v47_v47 = vld [vmem:[%s404_s1 + $0xf0] sm:$0xff]  ;;  %v57_v53 = vsub.s32 1, %v52_v52  ;;  %v53_v0 = vsub.s32 0, %v52_v52 }
  0x10   :  { %v206_v45 = vpack.c.bf16 %v48_v43, %v46_v42  ;;  %v208_v48 = vpack.c.bf16 %v47_v47, %v45_v46  ;;  %v15_v49 = vld [vmem:[%s403_s0] sm:$0xff]  ;;  %v16_v50 = vld [vmem:[%s403_s0 + $0x8] sm:$0xff]  ;;  %s263_s0 = smov [#allocation2]  }
  0x11   :  { %193 = vmatpush1.bf16.msra.mxu0 %v192_v26  ;;  %221 = vmatpush1.bf16.msra.mxu1 %v192_v26  ;;  %v49_v54 = vld [vmem:[%s405_s2] sm:$0x3]  ;;  %s165_s2 = sshll.u32 %s263_s0, 4  ;;  %s166_s2 = int_to_ptr.vmem [resolvable:$true] %s165_s2 }
  0x12   :  { %195 = vmatprep.subr.bf16.mxu0 %v194_v27  ;;  %214 = vmatprep.subr.bf16.mxu1 %v194_v27  ;;  %v58_v55 = vrot.slane %v49_v54, %v57_v53  ;;  %v54_v2 = vrot.slane %v49_v54, %v53_v0  ;;  %s238_s27 = scalar_lea.vmem %s166_s2, 256  ;;  %p243_p1 = scmp.lt.s32.totalorder %s166_s2, %s166_s2 }
  0x13   :  { %p239_p0 = scmp.ne.s32.totalorder %s166_s2, %s238_s27  ;;  %p244_p2 = scmp.lt.s32.totalorder %s238_s27, %s238_s27 }
  0x15   :  { %197 = vmatpush1.bf16.msra.mxu0 %v196_v32  ;;  %222 = vmatpush1.bf16.msra.mxu1 %v196_v32  ;;  %p245_p3 = por %p244_p2, %p243_p1 }
  0x16   :  { %199 = vmatprep.subr.bf16.mxu0 %v198_v33  ;;  %215 = vmatprep.subr.bf16.mxu1 %v198_v33 }
  0x17   :  { %p246_p4 = pnand %p245_p3, %p239_p0 }
  0x19   :  { %201 = vmatpush1.bf16.msra.mxu0 %v200_v38  ;;  %223 = vmatpush1.bf16.msra.mxu1 %v200_v38 }
  0x1a   :  { %203 = vmatprep.subr.bf16.mxu0 %v202_v39  ;;  %216 = vmatprep.subr.bf16.mxu1 %v202_v39 }
  0x1d   :  { %205 = vmatpush1.bf16.msra.mxu0 %v204_v44  ;;  %224 = vmatpush1.bf16.msra.mxu1 %v204_v44 }
  0x1e   :  { %207 = vmatprep.subr.bf16.mxu0 %v206_v45  ;;  %217 = vmatprep.subr.bf16.mxu1 %v206_v45 }
  0x21   :  { %209 = vmatpush1.bf16.msra.mxu0 %v208_v48  ;;  %225 = vmatpush1.bf16.msra.mxu1 %v208_v48 }
  0x24   :  { %126 = vmatmul.mubr.f32.vlgmr.msra.gmra.mrb[0].mxu0 %v15_v49  ;;  %132 = vmatmul.mubr.f32.vlgmr.msra.gmra.mrb[0].mxu1 %v16_v50 }
  0xf7   :  { %v127_v56 = vpop.f32.mrb[0].mxu0  ;;  %v133_v57 = vpop.f32.mrb[0].mxu1 }
  0xf8   :  { %v129_v58 = vpop.f32.mrb[1].mxu0  ;;  %v135_v59 = vpop.f32.mrb[1].mxu1  ;;  %v128_v6 = vadd.f32 %v127_v56, %v54_v2  ;;  %v134_v7 = vadd.f32 %v133_v57, %v54_v2 }
  0xf9   :  { %v130_v60 = vadd.f32 %v129_v58, %v58_v55  ;;  %v136_v61 = vadd.f32 %v135_v59, %v58_v55 }
  0xfa   :  { %v138_v8 = vmax.f32 %v128_v6, 0.0  ;;  %v139_v9 = vmax.f32 %v134_v7, 0.0 }
  0xfb   :  { %v176_v62 = vmul.f32 -1.442695, %v130_v60  ;;  %v177_v63 = vmul.f32 -1.442695, %v136_v61 }
  0xfc   :  { %v152_v10 = vsub.f32 %v138_v8, %v15_v49  ;;  %v153_v12 = vsub.f32 %v139_v9, %v16_v50 }
  0xfd   :  { %230 = vpow2.f32 %v176_v62 }
  0xfe   :  { %232 = vpow2.f32 %v177_v63 }
 0x107   :  { %v231_v1 = vpop.eup %230 }
 0x108   :  { %v233_v3 = vpop.eup %232  ;;  %v146_v4 = vadd.f32 1.0, %v231_v1 }
 0x109   :  { %v147_v5 = vadd.f32 1.0, %v233_v3 }
 0x10a   :  { %234 = vrcp.f32 %v146_v4 }
 0x10b   :  { %236 = vrcp.f32 %v147_v5 }
 0x114   :  { %v235_v11 = vpop.eup %234 }
 0x115   :  { %v237_v13 = vpop.eup %236  ;;  %v154_v14 = vmul.f32 %v235_v11, %v152_v10 }
 0x116   :  { %v155_v15 = vmul.f32 %v237_v13, %v153_v12 }
 0x117   :  { %v156_v16 = vadd.f32 %v154_v14, %v15_v49 }
 0x118   :  { %v157_v17 = vadd.f32 %v155_v15, %v16_v50 }
 0x119   :  { %158 = vst [vmem:[#allocation2] sm:$0xff] %v156_v16 }
 0x11a   :  { %159 = vst [vmem:[#allocation2 + $0x8] sm:$0xff] %v157_v17 }
 0x11b   :  { %249 = shalt.err (!%p246_p4)
}
 0x11c   :  { %s250_s30 = scalar_lea.hbm %s406_s3, 256 }
 0x11d   :  { %p251_p5 = scmp.ne.s32.totalorder %s406_s3, %s250_s30  ;;  %p254_p6 = scmp.lt.u32.totalorder %s250_s30, %s406_s3 }
 0x11f   :  { %p256_p7 = pnand %p254_p6, %p251_p5 }
 0x121   :  { %259 = shalt.err (!%p256_p7)
}
 0x122   :  { %s264_s8 = smov 128   ;;  %s265_s9 = smov 8  }
 0x123   :  { %171 = dma.vmem_to_hbm [thread:$0]  %s166_s2, 256, %s406_s3, [#allocation3], %s264_s8, %s264_s8, %s265_s9  }
 0x124   :  { %260 = dma.done.wait [#allocation3], 256  }
 0x125   :  { %261 = vsyncadd [#allocation3], 4294967040 }
 0x126   :  { %175 = vsyncpa [#allocation3], 1 }

</bundles_post_ra>
